<compile_context>
chip_gen: v5e
topology: v5e:2x2
jax: 0.10.0
libtpu: 0.0.40
codegen_flags: <defaults>
</compile_context>

<pallas_src>
import functools

import jax
import jax.numpy as jnp
from jax import lax
from jax.experimental import pallas as pl
from jax.experimental.pallas import tpu as pltpu


def _feat_mse_kernel(*refs, use_adapter, hw, thw, n_ji, needs_mask, mxu_min_cs):
    """One grid step: bn batch elements x all channels x one spatial tile.

    refs (adapter):    s_ref (bn,Cs,thw), t_ref (bn,Ct,thw),
                       w_ref (Ct,Cs) f32, b_ref (Ct,1) f32, out_ref (1,128)
    refs (no adapter): s_ref, t_ref, out_ref
    The output block is resident across the inner ("arbitrary") spatial axis
    and is used directly as the accumulator (no scratch).
    """
    if use_adapter:
        s_ref, t_ref, w_ref, b_ref, out_ref = refs
    else:
        s_ref, t_ref, out_ref = refs

    jo = pl.program_id(1)
    ji = pl.program_id(2)

    @pl.when(ji == 0)
    def _():
        out_ref[...] = jnp.zeros_like(out_ref)

    bn, cs, _ = s_ref.shape
    s32 = s_ref[...].astype(jnp.float32)          # (bn, Cs, thw)
    t32 = t_ref[...].astype(jnp.float32)          # (bn, Ct, thw)

    if use_adapter:
        w32 = w_ref[...]                          # (Ct, Cs) f32, resident
        bcol = b_ref[...]                         # (Ct, 1)  f32, resident
        if cs >= mxu_min_cs:
            # Large contraction: MXU.  (Cast to bf16 here if loss tolerance
            # allows more MXU throughput; kept f32 for exactness.)
            per_b = []
            for b in range(bn):
                a = jnp.dot(w32, s32[b], preferred_element_type=jnp.float32)
                per_b.append(a + (bcol - t32[b]))
            diff = per_b[0][None] if bn == 1 else jnp.stack(per_b, axis=0)
        else:
            # Tiny contraction (e.g. Cs=4): unrolled VPU outer-product
            # accumulation seeded with (bias - teacher): (b + W.s) - t.
            diff = bcol[None, :, :] - t32
            for c in range(cs):
                diff = diff + w32[:, c:c + 1][None, :, :] * s32[:, c:c + 1, :]
    else:
        diff = s32 - t32

    sq = diff * diff                              # (bn, Ct, thw) f32

    def accumulate(v):
        out_ref[...] += jnp.full(out_ref.shape, jnp.sum(v), jnp.float32)

    if not needs_mask:
        accumulate(sq)
    else:
        jt = jo * n_ji + ji                       # logical spatial tile index
        is_edge = (jt + 1) * thw > hw             # tile has overhang columns?

        def masked():
            col = jt * thw + lax.broadcasted_iota(jnp.int32, (1, 1, thw), 2)
            # select (not multiply): garbage/NaN overhang columns become 0.
            accumulate(jnp.where(col < hw, sq, 0.0))

        @pl.when(is_edge)
        def _():
            masked()

        @pl.when(jnp.logical_not(is_edge))
        def _():
            accumulate(sq)


def intermediate_feature_loss(student_feat, teacher_feat, weight=None,
                              bias=None, *, use_adapter=True,
                              tile_bytes=3 * 1024 * 1024, mxu_min_cs=16):
    """Pallas implementation of IntermediateFeatureLoss.forward.

    student_feat : (N, Cs, H, W)   NCHW, native dtype (f32 / bf16)
    teacher_feat : (N, Ct, H, W)
    weight       : (Ct, Cs, 1, 1)  Conv2d 1x1 weight (PyTorch layout)
    bias         : (Ct,)
    Returns scalar f32 MSE (mean over all teacher-shaped elements), matching
    nn.MSELoss() default 'mean' reduction.
    """
    n, cs, h, w_ = student_feat.shape
    nt, ct, ht, wt = teacher_feat.shape
    assert (n, h, w_) == (nt, ht, wt)
    hw = h * w_

    # NCHW already has C before the spatial axes: (N, C, H*W) view is free and
    # puts the big spatial axis on the 128-wide lane dimension.
    s3 = student_feat.reshape(n, cs, hw)
    t3 = teacher_feat.reshape(n, ct, hw)

    its = jnp.dtype(student_feat.dtype).itemsize
    itt = jnp.dtype(teacher_feat.dtype).itemsize
    col_bytes = cs * its + ct * itt               # HBM bytes per lane column

    # Spatial tile: multiple of 128, capped by the array and a byte budget.
    hw128 = ((hw + 127) // 128) * 128
    thw_cap = (tile_bytes // col_bytes) // 128 * 128
    thw = max(128, min(hw128, thw_cap))
    n_tiles = pl.cdiv(hw, thw)

    # Batch blocking: pack several batch elements per step when tiles are
    # small, but keep >= 2 batch blocks when N >= 2 (megacore on v7x).
    bn_cap = max(1, tile_bytes // (thw * col_bytes))
    if n >= 2:
        bn_cap = min(bn_cap, n // 2)
    bn_cap = min(bn_cap, n, 32 if (use_adapter and cs >= mxu_min_cs) else 256)
    bn = max(d for d in range(1, bn_cap + 1) if n % d == 0)
    n_blocks = n // bn

    # Megacore-friendly split of the spatial-tile axis when N cannot shard.
    if n_blocks == 1 and n_tiles >= 2:
        n_jo, n_ji = 2, pl.cdiv(n_tiles, 2)
    else:
        n_jo, n_ji = 1, n_tiles

    needs_mask = (n_jo * n_ji * thw) != hw

    def spatial_map(i, jo, ji):
        jt = jo * n_ji + ji
        # Clamp fully-out-of-range chunk tiles onto the last valid block; the
        # kernel masks them to zero using the logical tile index.
        return (i, 0, jnp.minimum(jt, n_tiles - 1))

    s_spec = pl.BlockSpec((bn, cs, thw), spatial_map)
    t_spec = pl.BlockSpec((bn, ct, thw), spatial_map)
    out_spec = pl.BlockSpec((None, None, 1, 128), lambda i, jo, ji: (i, jo, 0, 0))
    out_shape = jax.ShapeDtypeStruct((n_blocks, n_jo, 1, 128), jnp.float32)

    kernel = functools.partial(
        _feat_mse_kernel, use_adapter=use_adapter, hw=hw, thw=thw, n_ji=n_ji,
        needs_mask=needs_mask, mxu_min_cs=mxu_min_cs)

    if use_adapter:
        assert weight is not None and bias is not None
        w2d = weight.reshape(ct, cs).astype(jnp.float32)
        bcol = bias.reshape(ct, 1).astype(jnp.float32)
        in_specs = [s_spec, t_spec,
                    pl.BlockSpec((ct, cs), lambda i, jo, ji: (0, 0)),
                    pl.BlockSpec((ct, 1), lambda i, jo, ji: (0, 0))]
        operands = (s3, t3, w2d, bcol)
        flops = 2 * n * hw * cs * ct + 3 * n * hw * ct
    else:
        assert cs == ct, "use_adapter=False requires matching channel counts"
        in_specs = [s_spec, t_spec]
        operands = (s3, t3)
        flops = 3 * n * hw * ct

    cost = pl.CostEstimate(
        flops=flops, transcendentals=0,
        bytes_accessed=n * hw * col_bytes + n_blocks * n_jo * 128 * 4)

    partials = pl.pallas_call(
        kernel,
        out_shape=out_shape,
        grid_spec=pltpu.PrefetchScalarGridSpec(
            num_scalar_prefetch=0,
            grid=(n_blocks, n_jo, n_ji),
            in_specs=in_specs,
            out_specs=out_spec,
        ),
        compiler_params=pltpu.CompilerParams(
            dimension_semantics=("parallel", "parallel", "arbitrary"),
            vmem_limit_bytes=32 * 1024 * 1024),
        cost_estimate=cost,
    )(*operands)

    # Every lane of an output block holds the same per-(batch-block, chunk)
    # partial SSE; take lane 0 and finish the mean in f32.
    sse = jnp.sum(partials[:, :, 0, 0])
    return (sse / (n * ct * hw)).astype(jnp.float32)


if __name__ == "__main__":
    key = jax.random.PRNGKey(0)
    ks = jax.random.split(key, 12)

    def conv_params(k1, k2, cs, ct):
        bound = 1.0 / jnp.sqrt(jnp.float32(cs))
        w = jax.random.uniform(k1, (ct, cs, 1, 1), jnp.float32, -bound, bound)
        b = jax.random.uniform(k2, (ct,), jnp.float32, -bound, bound)
        return w, b

    def ref_loss(s, t, w=None, b=None, use_adapter=True):
        s32 = s.astype(jnp.float32)
        t32 = t.astype(jnp.float32)
        if use_adapter:
            s32 = (jnp.einsum("nchw,oc->nohw", s32, w[:, :, 0, 0],
                              precision=jax.lax.Precision.HIGHEST)
                   + b[None, :, None, None])
        return jnp.mean((s32 - t32) ** 2)

    def check(name, got, want, rtol=1e-5, atol=1e-6):
        got = jax.block_until_ready(got)
        assert jnp.allclose(got, want, rtol=rtol, atol=atol), (name, got, want)

    # 1) Adapter, VPU path, lane-aligned spatial size.
    N, Cs, Ct, H, W = 2, 4, 8, 16, 16
    s1 = jax.random.normal(ks[0], (N, Cs, H, W), jnp.float32)
    t1 = jax.random.normal(ks[1], (N, Ct, H, W), jnp.float32)
    w1, b1 = conv_params(ks[2], ks[3], Cs, Ct)
    check("adapter_aligned",
          intermediate_feature_loss(s1, t1, w1, b1, use_adapter=True),
          ref_loss(s1, t1, w1, b1, True))

    # 2) Adapter, spatial size not a multiple of 128 (edge-tile mask path).
    s2 = jax.random.normal(ks[4], (N, Cs, 10, 10), jnp.float32)
    t2 = jax.random.normal(ks[5], (N, Ct, 10, 10), jnp.float32)
    check("adapter_ragged",
          intermediate_feature_loss(s2, t2, w1, b1, use_adapter=True),
          ref_loss(s2, t2, w1, b1, True))

    # 3) No-adapter path (channel counts already match).
    t3_ = jax.random.normal(ks[6], (N, Cs, H, W), jnp.float32)
    check("no_adapter",
          intermediate_feature_loss(s1, t3_, use_adapter=False),
          ref_loss(s1, t3_, use_adapter=False))

    # 4) Adapter, MXU path (Cs >= 16), odd batch, ragged spatial size.
    s4 = jax.random.normal(ks[7], (3, 32, 12, 12), jnp.float32)
    t4 = jax.random.normal(ks[8], (3, 16, 12, 12), jnp.float32)
    w4, b4 = conv_params(ks[9], ks[10], 32, 16)
    check("adapter_mxu",
          intermediate_feature_loss(s4, t4, w4, b4, use_adapter=True),
          ref_loss(s4, t4, w4, b4, True), rtol=1e-3, atol=1e-4)

    # 5) N=1 megacore split of the spatial axis: small tile_bytes forces
    #    several spatial tiles; odd tile count exercises the dead-tile path.
    s5 = jax.random.normal(ks[11], (1, Cs, 60, 60), jnp.float32)
    t5 = jax.random.normal(ks[0], (1, Ct, 60, 60), jnp.float32)
    check("megacore_split",
          intermediate_feature_loss(s5, t5, w1, b1, use_adapter=True,
                                    tile_bytes=64 * 1024),
          ref_loss(s5, t5, w1, b1, True))

    # 6) bf16 features (cast to f32 inside the kernel, no f32 HBM copies).
    s6 = s1.astype(jnp.bfloat16)
    t6 = t1.astype(jnp.bfloat16)
    check("bf16_inputs",
          intermediate_feature_loss(s6, t6, w1, b1, use_adapter=True),
          ref_loss(s6, t6, w1, b1, True), rtol=1e-4, atol=1e-5)

    print("KERNEL_OK")
</pallas_src>

<mosaic_0001>
module attributes {stable_mosaic.version = 11 : i64} {
  func.func @_feat_mse_kernel(%arg0: i32, %arg1: i32, %arg2: i32, %arg3: memref<1x4x256xf32, #tpu.memory_space<vmem>>, %arg4: memref<1x8x256xf32, #tpu.memory_space<vmem>>, %arg5: memref<8x4xf32, #tpu.memory_space<vmem>>, %arg6: memref<8x1xf32, #tpu.memory_space<vmem>>, %arg7: memref<1x1x1x128xf32, #tpu.memory_space<vmem>>) attributes {dimension_semantics = [#tpu.dimension_semantics<parallel>, #tpu.dimension_semantics<parallel>, #tpu.dimension_semantics<arbitrary>], iteration_bounds = array<i64: 2, 1, 1>, scalar_prefetch = 0 : i64, scratch_operands = 0 : i64, tpu.core_type = #tpu.core_type<tc>, window_params = [{transform_indices = @transform_0, window_bounds = array<i64: 1, 4, 256>}, {transform_indices = @transform_1, window_bounds = array<i64: 1, 8, 256>}, {pipeline_mode = #tpu.pipeline_mode<synchronous>, transform_indices = @transform_2, window_bounds = array<i64: 8, 4>}, {pipeline_mode = #tpu.pipeline_mode<synchronous>, transform_indices = @transform_3, window_bounds = array<i64: 8, 1>}, {transform_indices = @transform_4, window_bounds = array<i64: 1, 1, 1, 128>}]} {
    %c0_i32 = arith.constant 0 : i32
    %0 = arith.cmpi eq, %arg2, %c0_i32 : i32
    %1 = arith.extui %0 : i1 to i32
    %c0_i32_0 = arith.constant 0 : i32
    %2 = arith.cmpi ne, %1, %c0_i32_0 : i32
    scf.if %2 {
      %cst_18 = arith.constant 0.000000e+00 : f32
      %50 = vector.broadcast %cst_18 : f32 to vector<1x128xf32>
      %c0_19 = arith.constant 0 : index
      %c0_20 = arith.constant 0 : index
      %c0_21 = arith.constant 0 : index
      %c0_22 = arith.constant 0 : index
      %51 = vector.load %arg7[%c0_19, %c0_20, %c0_21, %c0_22] : memref<1x1x1x128xf32, #tpu.memory_space<vmem>>, vector<1x1x1x128xf32>
      %52 = vector.shape_cast %51 : vector<1x1x1x128xf32> to vector<1x128xf32>
      %53 = vector.shape_cast %50 : vector<1x128xf32> to vector<1x1x1x128xf32>
      tpu.vector_store %arg7[%c0_19, %c0_20, %c0_21, %c0_22], %53 {strides = array<i32>} : memref<1x1x1x128xf32, #tpu.memory_space<vmem>>, vector<1x1x1x128xf32>,
    } else {
    }
    %c0 = arith.constant 0 : index
    %c0_1 = arith.constant 0 : index
    %c0_2 = arith.constant 0 : index
    %3 = vector.load %arg3[%c0, %c0_1, %c0_2] : memref<1x4x256xf32, #tpu.memory_space<vmem>>, vector<1x4x256xf32>
    %c0_3 = arith.constant 0 : index
    %c0_4 = arith.constant 0 : index
    %c0_5 = arith.constant 0 : index
    %4 = vector.load %arg4[%c0_3, %c0_4, %c0_5] : memref<1x8x256xf32, #tpu.memory_space<vmem>>, vector<1x8x256xf32>
    %c0_6 = arith.constant 0 : index
    %c0_7 = arith.constant 0 : index
    %5 = vector.load %arg5[%c0_6, %c0_7] : memref<8x4xf32, #tpu.memory_space<vmem>>, vector<8x4xf32>
    %c0_8 = arith.constant 0 : index
    %c0_9 = arith.constant 0 : index
    %6 = vector.load %arg6[%c0_8, %c0_9] : memref<8x1xf32, #tpu.memory_space<vmem>>, vector<8x1xf32>
    %7 = vector.shape_cast %6 : vector<8x1xf32> to vector<1x8x1xf32>
    %8 = vector.broadcast %7 : vector<1x8x1xf32> to vector<1x8x256xf32>
    %9 = arith.subf %8, %4 : vector<1x8x256xf32>
    %10 = vector.extract_strided_slice %5 {offsets = [0, 0], sizes = [8, 1], strides = [1, 1]} : vector<8x4xf32> to vector<8x1xf32>
    %11 = vector.shape_cast %10 : vector<8x1xf32> to vector<1x8x1xf32>
    %12 = vector.extract_strided_slice %3 {offsets = [0, 0, 0], sizes = [1, 1, 256], strides = [1, 1, 1]} : vector<1x4x256xf32> to vector<1x1x256xf32>
    %13 = vector.broadcast %11 : vector<1x8x1xf32> to vector<1x8x256xf32>
    %14 = vector.broadcast %12 : vector<1x1x256xf32> to vector<1x8x256xf32>
    %15 = arith.mulf %13, %14 : vector<1x8x256xf32>
    %16 = arith.addf %9, %15 : vector<1x8x256xf32>
    %17 = vector.extract_strided_slice %5 {offsets = [0, 1], sizes = [8, 1], strides = [1, 1]} : vector<8x4xf32> to vector<8x1xf32>
    %18 = vector.shape_cast %17 : vector<8x1xf32> to vector<1x8x1xf32>
    %19 = vector.extract_strided_slice %3 {offsets = [0, 1, 0], sizes = [1, 1, 256], strides = [1, 1, 1]} : vector<1x4x256xf32> to vector<1x1x256xf32>
    %20 = vector.broadcast %18 : vector<1x8x1xf32> to vector<1x8x256xf32>
    %21 = vector.broadcast %19 : vector<1x1x256xf32> to vector<1x8x256xf32>
    %22 = arith.mulf %20, %21 : vector<1x8x256xf32>
    %23 = arith.addf %16, %22 : vector<1x8x256xf32>
    %24 = vector.extract_strided_slice %5 {offsets = [0, 2], sizes = [8, 1], strides = [1, 1]} : vector<8x4xf32> to vector<8x1xf32>
    %25 = vector.shape_cast %24 : vector<8x1xf32> to vector<1x8x1xf32>
    %26 = vector.extract_strided_slice %3 {offsets = [0, 2, 0], sizes = [1, 1, 256], strides = [1, 1, 1]} : vector<1x4x256xf32> to vector<1x1x256xf32>
    %27 = vector.broadcast %25 : vector<1x8x1xf32> to vector<1x8x256xf32>
    %28 = vector.broadcast %26 : vector<1x1x256xf32> to vector<1x8x256xf32>
    %29 = arith.mulf %27, %28 : vector<1x8x256xf32>
    %30 = arith.addf %23, %29 : vector<1x8x256xf32>
    %31 = vector.extract_strided_slice %5 {offsets = [0, 3], sizes = [8, 1], strides = [1, 1]} : vector<8x4xf32> to vector<8x1xf32>
    %32 = vector.shape_cast %31 : vector<8x1xf32> to vector<1x8x1xf32>
    %33 = vector.extract_strided_slice %3 {offsets = [0, 3, 0], sizes = [1, 1, 256], strides = [1, 1, 1]} : vector<1x4x256xf32> to vector<1x1x256xf32>
    %34 = vector.broadcast %32 : vector<1x8x1xf32> to vector<1x8x256xf32>
    %35 = vector.broadcast %33 : vector<1x1x256xf32> to vector<1x8x256xf32>
    %36 = arith.mulf %34, %35 : vector<1x8x256xf32>
    %37 = arith.addf %30, %36 : vector<1x8x256xf32>
    %38 = arith.mulf %37, %37 : vector<1x8x256xf32>
    %c0_10 = arith.constant 0 : index
    %c0_11 = arith.constant 0 : index
    %c0_12 = arith.constant 0 : index
    %c0_13 = arith.constant 0 : index
    %39 = vector.load %arg7[%c0_10, %c0_11, %c0_12, %c0_13] : memref<1x1x1x128xf32, #tpu.memory_space<vmem>>, vector<1x1x1x128xf32>
    %40 = vector.shape_cast %39 : vector<1x1x1x128xf32> to vector<1x128xf32>
    %41 = vector.shape_cast %38 : vector<1x8x256xf32> to vector<1x1x8x256xf32>
    %cst = arith.constant dense<0.000000e+00> : vector<1xf32>
    %42 = vector.multi_reduction <add>, %41, %cst [1, 2, 3] : vector<1x1x8x256xf32> to vector<1xf32>
    %43 = vector.shape_cast %42 : vector<1xf32> to vector<1x1x1x1xf32>
    %44 = vector.extract %43[0, 0, 0, 0] : f32 from vector<1x1x1x1xf32>
    %45 = vector.broadcast %44 : f32 to vector<1x128xf32>
    %46 = arith.addf %40, %45 : vector<1x128xf32>
    %c0_14 = arith.constant 0 : index
    %c0_15 = arith.constant 0 : index
    %c0_16 = arith.constant 0 : index
    %c0_17 = arith.constant 0 : index
    %47 = vector.load %arg7[%c0_14, %c0_15, %c0_16, %c0_17] : memref<1x1x1x128xf32, #tpu.memory_space<vmem>>, vector<1x1x1x128xf32>
    %48 = vector.shape_cast %47 : vector<1x1x1x128xf32> to vector<1x128xf32>
    %49 = vector.shape_cast %46 : vector<1x128xf32> to vector<1x1x1x128xf32>
    tpu.vector_store %arg7[%c0_14, %c0_15, %c0_16, %c0_17], %49 {strides = array<i32>} : memref<1x1x1x128xf32, #tpu.memory_space<vmem>>, vector<1x1x1x128xf32>,
    return
  }
  func.func @transform_0(%arg0: i32, %arg1: i32, %arg2: i32) -> (i32, i32, i32) {
    %c1_i32 = arith.constant 1 : i32
    %0 = arith.muli %arg1, %c1_i32 : i32
    %1 = arith.addi %0, %arg2 : i32
    %c0_i32 = arith.constant 0 : i32
    %2 = arith.minsi %1, %c0_i32 : i32
    %c0_i32_0 = arith.constant 0 : i32
    %c0_i32_1 = arith.constant 0 : i32
    return %arg0, %c0_i32_0, %2 : i32, i32, i32
  }
  func.func @transform_1(%arg0: i32, %arg1: i32, %arg2: i32) -> (i32, i32, i32) {
    %c1_i32 = arith.constant 1 : i32
    %0 = arith.muli %arg1, %c1_i32 : i32
    %1 = arith.addi %0, %arg2 : i32
    %c0_i32 = arith.constant 0 : i32
    %2 = arith.minsi %1, %c0_i32 : i32
    %c0_i32_0 = arith.constant 0 : i32
    %c0_i32_1 = arith.constant 0 : i32
    return %arg0, %c0_i32_0, %2 : i32, i32, i32
  }
  func.func @transform_2(%arg0: i32, %arg1: i32, %arg2: i32) -> (i32, i32) {
    %c0_i32 = arith.constant 0 : i32
    %c0_i32_0 = arith.constant 0 : i32
    %c0_i32_1 = arith.constant 0 : i32
    return %c0_i32, %c0_i32_0 : i32, i32
  }
  func.func @transform_3(%arg0: i32, %arg1: i32, %arg2: i32) -> (i32, i32) {
    %c0_i32 = arith.constant 0 : i32
    %c0_i32_0 = arith.constant 0 : i32
    %c0_i32_1 = arith.constant 0 : i32
    return %c0_i32, %c0_i32_0 : i32, i32
  }
  func.func @transform_4(%arg0: i32, %arg1: i32, %arg2: i32) -> (i32, i32, i32, i32) {
    %c0_i32 = arith.constant 0 : i32
    %c0_i32_0 = arith.constant 0 : i32
    %c0_i32_1 = arith.constant 0 : i32
    return %arg0, %arg1, %c0_i32, %c0_i32_0 : i32, i32, i32, i32
  }
}

</mosaic_0001>

<bundles_post_ra>
// kernel: tpu_custom_call.1
= control target key start
LH: loop header
LB: loop body
LE: loop exit
PB: predicated region body
PF: predicated region fallthrough
CT: control target
= control target key end

     0   :  { %9 = vsyncpa [#allocation3], 0  ;;  %s883_s0 = inlined_call_operand.vmem [shape: f32[2,4,256], index: 0, kind: input, shape index: {}]   ;;  %s884_s1 = inlined_call_operand.hbm [shape: f32[2,8,256], index: 1, kind: input, shape index: {}]   ;;  %s885_s2 = inlined_call_operand.vmem [shape: f32[8,4], index: 2, kind: input, shape index: {}]   ;;  %s886_s3 = inlined_call_operand.vmem [shape: f32[8,1], index: 3, kind: input, shape index: {}]   ;;  %s887_s4 = inlined_call_operand.hbm [shape: f32[2,1,1,128], index: 4, kind: output, shape index: {}]  }
   0x1   :  { %11 = vsyncpa [#allocation3 + $0x1], 0 }
   0x2   :  { %12 = vsyncpa [#allocation4], 0 }
   0x3   :  { %14 = vsyncpa [#allocation4 + $0x1], 0  ;;  %s747_s15 = smov 0   ;;  %s749_s16 = smov 0  }
   0x4   :  { %s751_s17 = smov 0   ;;  %s753_s18 = smov 0  }
   0x5   :  { %s755_s19 = smov 0   ;;  %s757_s20 = smov 0  }
   0x6 LB: > { %s514_s21 = sadd.s32 4294967295, %s715_s20   ;;  %s515_s22 = sadd.s32 4294967294, %s715_s20   ;;  %s715_s20 = sphi %s757_s20, %s20_s20   ;;  %s711_s19 = sphi %s755_s19, %s896_s19   ;;  %s707_s18 = sphi %s753_s18, %s895_s18   ;;  %s703_s17 = sphi %s751_s17, %s894_s17   ;;  %s699_s16 = sphi %s749_s16, %s893_s16   ;;  %s695_s15 = sphi %s747_s15, %s892_s15  }
   0x7   : > { %s39_s23 = sadd.s32 1, %s711_s19  ;;  %s88_s24 = sadd.s32 1, %s703_s17 }
   0x8   : > { %p41_p0 = scmp.ge.s32.totalorder %s39_s23, 2  ;;  %p95_p1 = scmp.ne.s32.totalorder %s703_s17, %s699_s16 }
   0x9   : > { %p96_p2 = scmp.eq.s32.totalorder %s715_s20, 0  ;;  %p101_p3 = scmp.ne.s32.totalorder %s699_s16, %s695_s15 }
   0xa   : > { %s898_s23 = smov (%p41_p0, %s39_s23), 0  ;;  %p102_p5 = scmp.eq.s32.totalorder %s514_s21, 0 }
   0xb   : > { %p788_p4 = por %p96_p2, %p95_p1  ;;  %s83_s26 = ssub.s32 %s711_s19, %s898_s23 }
   0xc   : > { %p169_p6 = scmp.eq.s32.totalorder %s514_s21, 1  ;;  %p86_p7 = scmp.eq.s32.totalorder %s83_s26, 0 }
   0xd   : > { %p794_p8 = por %p102_p5, %p101_p3  ;;  %p175_p10 = scmp.eq.s32.totalorder %s515_s22, 1 }
   0xe   : > { %p798_p9 = por %p169_p6, %p95_p1  ;;  %p517_p12 = scmp.ge.s32.totalorder %s715_s20, 2 }
   0xf   : > { %s803_s29 = scalar_select %p86_p7, %s703_s17, %s88_s24  }
  0x10   : > { %p805_p11 = por %p175_p10, %p101_p3  ;;  %p543_p13 = scmp.lt.s32.totalorder %s715_s20, 2 }
  0x11   : > { %s220_s5 = sand.u32 1, %s703_s17   ;;  %s527_s7 = sshll.u32 %s711_s19, 4 }
  0x12   : > { %s518_s6 = sshll.u32 %s220_s5, 4  ;;  %s234_s10 = scalar_lea.hbm %s884_s1, %s527_s7 }
  0x13   : > { %s224_s11 = scalar_lea.vmem [#allocation2], %s518_s6  ;;  %s236_s13 = sshll.u32 %s234_s10, 4  ;;  %s237_s13 = int_to_ptr.hbm [resolvable:$true] %s236_s13 }
  0x14   : > { %s238_s12 = sshll.u32 %s224_s11, 4  ;;  %p536_p0 = pnand %p543_p13, %p788_p4  ;;  %s239_s12 = int_to_ptr.vmem [resolvable:$true] %s238_s12 }
  0x15   : > { %p521_p1 = scmp.ge.s32.totalorder %s715_s20, 1  ;;  %p243_p2 = scmp.lt.s32.totalorder %s715_s20, 3 }
  0x16   : > { %s221_s14 = scalar_lea.sflag [#allocation3], %s220_s5 }
  0x17   : > { %538 = dma.hbm_to_vmem [thread:$0]  (!%p536_p0), %s237_s13, 256, %s239_s12, %s221_s14  }
  0x18   : > { %p244_p3 = pnand %p521_p1, %p243_p2 }
  0x19   : > { %s821_s21 = sand.u32 (!%p244_p3), 1, %s699_s16  }
  0x1a   : > { %247 = sbr.rel (%p244_p3) target bundleno = 355 (0x163), region = 36  ;;  %s522_s22 = sshll.u32 (!%p244_p3), %s821_s21, 4 }
  0x1b   : > { %s250_s24 = scalar_lea.sflag (!%p244_p3), [#allocation3], %s821_s21  ;;  %s825_s26 = scalar_lea.vmem (!%p244_p3), [#allocation2], %s522_s22 }
  0x1f   : > { %686 = dma.done.wait (%p794_p8), %s250_s24, 256  }
  0x20   : > { %688 = vsyncadd (%p794_p8), %s250_s24, 4294967040  ;;  %v717_v0 = vmov 0   ;;  %v718_v1 = vmov 1   ;;  %v719_v2 = vmov 3   ;;  %v319_v3 = vld [vmem:[%s886_s3] sm:$0xff]  ;;  %v720_v5 = vmov 2   ;;  %s411_s22 = scalar_lea.hbm %s887_s4, %s707_s18 }
  0x21   : > { %598 = vset.pattern.permute.xlu0 %v717_v0  ;;  %599 = vset.pattern.permute.xlu1 %v718_v1  ;;  %v318_v4 = vld [vmem:[%s885_s2] sm:$0xff]  ;;  %p294_p4 = scmp.lt.s32.totalorder %s707_s18, 1  ;;  %v317_v20 = vld [vmem:[%s825_s26 + $0x8] sm:$0xff]  ;;  %s289_s12 = scalar_lea.vmem [#allocation5], %s821_s21  ;;  %v721_v51 = vmov 0.0  }
  0x22   : > { %601 = vset.pattern.permute.xlu2 %v719_v2  ;;  %322 = vperm.xlu0 %598, %v319_v3   ;;  %v316_v19 = vld [vmem:[%s825_s26] sm:$0xff]  ;;  %314 = vst [vmem:[%s289_s12] sm:$0x1] %v721_v51  ;;  %s413_s24 = sshll.u32 %s289_s12, 4  ;;  %s415_s26 = sshll.u32 %s411_s22, 4  ;;  %s414_s24 = int_to_ptr.vmem [resolvable:$true] %s413_s24  ;;  %s416_s26 = int_to_ptr.hbm [resolvable:$true] %s415_s26 }
  0x23   : > { %344 = vperm.xlu1 %599, %v318_v4   ;;  %372 = vperm.xlu2 %601, %v318_v4   ;;  %s295_s27 = scalar_select %p294_p4, %s707_s18, 1 }
  0x24   : > { %s402_s5 = scalar_lea.sflag [#allocation4], %s821_s21  ;;  %s647_s6 = sshra.s32 %s416_s26, 4  ;;  %s648_s6 = int_to_ptr.hbm [resolvable:$true] %s647_s6 }
  0x25   : > { %s528_s8 = sshll.u32 %s295_s27, 3  ;;  %s649_s7 = scalar_lea.hbm %s648_s6, 1 }
  0x26   : > { %s301_s11 = scalar_lea.vmem %s883_s0, %s528_s8  ;;  %p650_p5 = scmp.ne.s32.totalorder %s648_s6, %s649_s7 }
  0x27   : > { %v315_v6 = vld [vmem:[%s301_s11] sm:$0xff]  ;;  %s653_s18 = scalar_lea.hbm %s887_s4, 2  ;;  %p654_p8 = scmp.lt.s32.totalorder %s648_s6, %s887_s4 }
  0x28   : > { %v333_v9 = vperm.slane %v315_v6, 0  ;;  %v334_v10 = vperm.slane %v315_v6, 4  ;;  %v347_v11 = vperm.slane %v315_v6, 1  ;;  %v348_v12 = vperm.slane %v315_v6, 5  ;;  %p651_p6 = pnand %p650_p5, %p798_p9  ;;  %p655_p10 = scmp.lt.s32.totalorder %s653_s18, %s649_s7 }
  0x29   : > { %v361_v13 = vperm.slane %v315_v6, 2  ;;  %v362_v14 = vperm.slane %v315_v6, 6  ;;  %v375_v15 = vperm.slane %v315_v6, 3  ;;  %v376_v16 = vperm.slane %v315_v6, 7  ;;  %v387_v59 = vld [vmem:[%s289_s12] sm:$0x1] }
  0x2a   : > { %329 = vperm.xlu0 %598, %v318_v4   ;;  %v337_v17 = vperm.slane %v333_v9, 0  ;;  %v338_v18 = vperm.slane %v334_v10, 0  ;;  %v351_v21 = vperm.slane %v347_v11, 1  ;;  %v352_v22 = vperm.slane %v348_v12, 1  ;;  %p652_p7 = pneg %p651_p6  ;;  %p656_p13 = por %p655_p10, %p654_p8 }
  0x2b   : > { %600 = vset.pattern.permute.xlu1 %v720_v5  ;;  %v365_v23 = vperm.slane %v361_v13, 2  ;;  %v366_v24 = vperm.slane %v362_v14, 2  ;;  %v379_v26 = vperm.slane %v375_v15, 3  ;;  %v380_v27 = vperm.slane %v376_v16, 3 }
  0x2c   : > { %358 = vperm.xlu1 %600, %v318_v4   ;;  %p657_p0 = pnand %p656_p13, %p652_p7 }
  0x32   : > { %602 = vset.pattern.permute.xlu0 %v719_v2 }
  0x7d   : > { %v373_v35 = vpop.permute.xlu2 %372 }
  0x7e   : > { %v381_v42 = vmul.f32 %v379_v26, %v373_v35  ;;  %v382_v43 = vmul.f32 %v380_v27, %v373_v35 }
  0x94   : > { %v323_v7 = vpop.permute.xlu0 %322 }
  0x95   : > { %v345_v8 = vpop.permute.xlu1 %344  ;;  %v325_v28 = vsub.f32 %v323_v7, %v316_v19  ;;  %v326_v29 = vsub.f32 %v323_v7, %v317_v20 }
  0x96   : > { %v353_v33 = vmul.f32 %v351_v21, %v345_v8  ;;  %v354_v34 = vmul.f32 %v352_v22, %v345_v8 }
  0x9c   : > { %v330_v25 = vpop.permute.xlu0 %329 }
  0x9d   : > { %v339_v30 = vmul.f32 %v337_v17, %v330_v25  ;;  %v340_v31 = vmul.f32 %v338_v18, %v330_v25 }
  0x9e   : > { %v359_v32 = vpop.permute.xlu1 %358 }
  0x9f   : > { %v341_v36 = vadd.f32 %v339_v30, %v325_v28  ;;  %v342_v37 = vadd.f32 %v340_v31, %v326_v29  ;;  %v367_v38 = vmul.f32 %v365_v23, %v359_v32  ;;  %v368_v39 = vmul.f32 %v366_v24, %v359_v32 }
  0xa1   : > { %v355_v40 = vadd.f32 %v353_v33, %v341_v36  ;;  %v356_v41 = vadd.f32 %v354_v34, %v342_v37 }
  0xa3   : > { %v369_v44 = vadd.f32 %v367_v38, %v355_v40  ;;  %v370_v45 = vadd.f32 %v368_v39, %v356_v41 }
  0xa5   : > { %v383_v46 = vadd.f32 %v381_v42, %v369_v44  ;;  %v384_v47 = vadd.f32 %v382_v43, %v370_v45 }
  0xa7   : > { %v385_v48 = vmul.f32 %v383_v46, %v383_v46  ;;  %v386_v49 = vmul.f32 %v384_v47, %v384_v47 }
  0xa9   : > { %v388_v50 = vadd.f32 %v386_v49, %v385_v48 }
  0xab   : > { %389 = vadd.xlane.f32.xlu2 %v388_v50 }
 0x11e   : > { %v390_v52 = vpop.xlane.xlu2 %389 }
 0x11f   : > { %v391_v53 = vrot.slane %v390_v52, 4 }
 0x121   : > { %v392_v54 = vadd.f32 %v391_v53, %v390_v52 }
 0x123   : > { %v393_v55 = vrot.slane %v392_v54, 2 }
 0x125   : > { %v394_v56 = vadd.f32 %v393_v55, %v392_v54 }
 0x127   : > { %v395_v57 = vrot.slane %v394_v56, 1 }
 0x129   : > { %v396_v58 = vadd.f32 %v395_v57, %v394_v56 }
 0x12b   : > { %529 = vpush %v396_v58 }
 0x15c   : > { %s530_s25 = spop %529 }
 0x15d   : > { %v398_v60 = vstv %s530_s25 }
 0x15e   : > { %v399_v61 = vadd.f32 %v398_v60, %v387_v59 }
 0x160   : > { %400 = vst [vmem:[%s289_s12] sm:$0x1] %v399_v61 }
 0x161   : > { %660 = shalt.err (!%p657_p0)
}
 0x162   : > { %533 = dma.vmem_to_hbm [thread:$0]  (%p798_p9), %s414_s24, 16, %s416_s26, %s402_s5  }
 0x163 PF: > { %s427_s21 = sand.u32 1, %s695_s15   ;;  %p540_p1 = pnand %p517_p12, %p805_p11 }
 0x164   : > { %s428_s11 = scalar_lea.sflag [#allocation4], %s427_s21 }
 0x165   : > { %p541_p2 = pneg %p540_p1 }
 0x167   : > { %690 = dma.done.wait (%p541_p2), %s428_s11, 16  }
 0x168   : > { %692 = vsyncadd (%p541_p2), %s428_s11, 4294967280  ;;  %s20_s20 = sadd.s32 1, %s715_s20   ;;  %s892_s15 = smov %s699_s16 }
 0x169   : > { %p17_p3 = scmp.ge.s32.totalorder %s20_s20, 4   ;;  %s893_s16 = smov %s703_s17 }
 0x16a   : > { %s894_s17 = smov %s803_s29  ;;  %s895_s18 = smov %s711_s19 }
 0x16b   : > { %s896_s19 = smov %s898_s23  ;;  %19 = sbr.rel (!%p17_p3) target bundleno = 6 (0x6), region = 88 }
 0x170   :  { %433 = vsyncpa [#allocation3], 1 }
 0x171   :  { %435 = vsyncpa [#allocation3 + $0x1], 1 }
 0x172   :  { %436 = vsyncpa [#allocation4], 1 }
 0x173   :  { %438 = vsyncpa [#allocation4 + $0x1], 1 }

</bundles_post_ra>
